<compile_context>
chip_gen: v5e
topology: v5e:2x2
jax: 0.10.0
libtpu: 0.0.40
codegen_flags: <defaults>
</compile_context>

<pallas_src>
import math
import functools

import jax
import jax.numpy as jnp
from jax.experimental import pallas as pl
from jax.experimental.pallas import tpu as pltpu


# ----------------------------------------------------------------------------
# Parameter setup (plain JAX): sinusoidal PE table exactly like the PyTorch
# __init__ (including the odd-d_model special case).
# ----------------------------------------------------------------------------
def make_pe_table(d_model: int, max_len: int = 36, dtype=jnp.float32):
    position = jnp.arange(max_len, dtype=jnp.float32)[:, None]            # (L, 1)
    div_term = jnp.exp(
        jnp.arange(0, d_model, 2, dtype=jnp.float32)
        * (-math.log(10000.0) / d_model)
    )
    angles = position * div_term                                          # (L, ceil(D/2))
    pe = jnp.zeros((max_len, d_model), dtype=jnp.float32)
    pe = pe.at[:, 0::2].set(jnp.sin(angles))
    if d_model % 2 != 0:
        pe = pe.at[:, 1::2].set(jnp.cos(angles)[:, :-1])
    else:
        pe = pe.at[:, 1::2].set(jnp.cos(angles))
    return pe[None].astype(dtype)                                         # (1, L, D)


# ----------------------------------------------------------------------------
# Kernels: operate on lane-dense 2-D blocks of identical shape (tr, C).
# ----------------------------------------------------------------------------
def _add_pe_kernel(x_ref, pe_ref, o_ref):
    # Eval-mode forward: x + pe (dropout is identity in eval). Same-shape add.
    o_ref[...] = x_ref[...] + pe_ref[...]


def _add_pe_dropout_kernel(x_ref, pe_ref, u_ref, o_ref, *, p, scale):
    # Training-mode forward: inverted dropout(x + pe) with a precomputed
    # uniform[0,1) mask streamed from HBM (portable: no TPU-only PRNG prims).
    y = x_ref[...] + pe_ref[...]
    keep = u_ref[...] >= jnp.float32(p)               # keep with prob (1 - p)
    o_ref[...] = jnp.where(
        keep, y * jnp.asarray(scale, y.dtype), jnp.zeros_like(y)
    ).astype(o_ref.dtype)


# ----------------------------------------------------------------------------
# Layout planning
# ----------------------------------------------------------------------------
_LANE_CAP = 16384          # max lane (column) width of the 2-D slab (mult. of 128)


def _round_up(x: int, m: int) -> int:
    return -(-x // m) * m


def _prev_pow2(x: int) -> int:
    return 1 << (max(int(x), 1).bit_length() - 1)


def _next_pow2(x: int) -> int:
    x = max(int(x), 1)
    return 1 << (x - 1).bit_length()


def _vmem_budget(n_streams: int):
    """Per-block byte budget + scoped VMEM limit, sized per TPU generation."""
    try:
        cap = int(pltpu.get_tpu_info().vmem_capacity_bytes)
    except Exception:               # no TPU visible / interpret mode: assume small VMEM
        cap = 64 * 1024 * 1024
    if cap >= 128 * 1024 * 1024:    # v5e / v6e (128 MiB physical VMEM)
        vmem_limit = 96 * 1024 * 1024
    else:                           # v7x (64 MiB) or unknown
        vmem_limit = 48 * 1024 * 1024
    # double-buffered streams + headroom
    max_block = vmem_limit // (2 * n_streams + 2)
    return max_block, vmem_limit


def _plan_layout(B, S, D, itemsize, max_block_bytes):
    """Factor the flat B*S*D elements into a (rows, C) slab.

    * C is a multiple of 128 (lane-dense output -> unmasked vst).
    * The PE pattern repeats every R_pe rows; R_pe and the row tile tr are kept
      powers of two, so tr % R_pe == 0 or R_pe % tr == 0 always holds and a
      modular PE index_map lines up exactly (same-shape add in the kernel).
    * tr is a multiple of the sublane count (8 f32 / 16 bf16) unless the whole
      slab is smaller than that (then one full-height block is used).
    """
    per_batch = S * D
    if per_batch <= _LANE_CAP:
        r_pe = 1
        C = _round_up(per_batch, 128)
    else:
        r_pe = _next_pow2(-(-per_batch // _LANE_CAP))
        C = _round_up(-(-per_batch // r_pe), 128)
    Lp = r_pe * C                      # padded per-batch length
    R = B * r_pe                       # total rows of the slab

    sub = max(8, 32 // itemsize)       # sublane multiple (8 for f32, 16 for bf16)
    if R <= sub:
        tr = R                         # single full-height block (tiny inputs)
    else:
        rows_budget = max(sub, max_block_bytes // (C * itemsize))
        tr = max(sub, _prev_pow2(rows_budget))
        # keep >= 2 row tiles so both v7x TensorCores get work
        while tr >= R and tr > sub:
            tr //= 2
    Rp = _round_up(R, tr)
    return C, r_pe, Lp, R, tr, Rp


# ----------------------------------------------------------------------------
# Wrapper
# ----------------------------------------------------------------------------
def positional_encoding(x, pe, *, dropout_p=0.1, training=False, seed=0):
    """Forward of PositionalEncoding: dropout(x + pe[:, :S, :]).

    x: (B, S, D); pe: (1, max_len, D) with max_len >= S.
    """
    B, S, D = x.shape
    per_batch = S * D
    itemsize = jnp.dtype(x.dtype).itemsize
    apply_dropout = bool(training) and float(dropout_p) > 0.0

    if apply_dropout and float(dropout_p) >= 1.0:
        return jnp.zeros_like(x)       # nn.Dropout(p=1) zeroes everything

    n_streams = 4 if apply_dropout else 3          # x, pe, (mask,), out
    max_block, vmem_limit = _vmem_budget(n_streams)
    C, r_pe, Lp, R, tr, Rp = _plan_layout(B, S, D, itemsize, max_block)

    # --- lane-dense, full-sublane 2-D slabs (padding is sliced back off) -----
    x2 = x.reshape(B, per_batch)
    pe_flat = pe[:, :S, :].astype(x.dtype).reshape(per_batch)
    if Lp != per_batch:
        x2 = jnp.pad(x2, ((0, 0), (0, Lp - per_batch)))
        pe_flat = jnp.pad(pe_flat, (0, Lp - per_batch))
    x_rows = x2.reshape(R, C)
    if Rp != R:
        x_rows = jnp.pad(x_rows, ((0, Rp - R), (0, 0)))

    pe_rows = pe_flat.reshape(r_pe, C)
    P = max(tr, r_pe)                  # rows of the PE operand
    if P > r_pe:                       # small PE: pre-tile once -> same-shape add
        pe_rows = jnp.tile(pe_rows, (P // r_pe, 1))
    pe_nblk = P // tr                  # x row-block i reads PE row-block i % pe_nblk

    n_tiles = Rp // tr
    x_spec = pl.BlockSpec((tr, C), lambda i: (i, 0))
    pe_spec = pl.BlockSpec((tr, C), lambda i: (i % pe_nblk, 0))
    u_spec = pl.BlockSpec((tr, C), lambda i: (i, 0))
    out_spec = pl.BlockSpec((tr, C), lambda i: (i, 0))

    compiler_params = pltpu.CompilerParams(
        dimension_semantics=("parallel",),         # row tiles are independent
        vmem_limit_bytes=vmem_limit,
    )

    if not apply_dropout:
        cost = pl.CostEstimate(
            flops=Rp * C,
            transcendentals=0,
            bytes_accessed=(2 * Rp + P) * C * itemsize,
        )
        out_rows = pl.pallas_call(
            _add_pe_kernel,
            out_shape=jax.ShapeDtypeStruct((Rp, C), x.dtype),
            grid=(n_tiles,),
            in_specs=[x_spec, pe_spec],
            out_specs=out_spec,
            compiler_params=compiler_params,
            cost_estimate=cost,
        )(x_rows, pe_rows)
    else:
        # Portable dropout mask (uniform [0,1)) generated once in the wrapper.
        # TODO(synk): on real TPU silicon this could be pltpu.prng_random_bits
        # inside the kernel (no extra HBM read), but that primitive has no
        # interpret/CPU lowering.
        u = jax.random.uniform(jax.random.PRNGKey(seed), (Rp, C), jnp.float32)
        scale = 1.0 / (1.0 - float(dropout_p))
        kernel = functools.partial(
            _add_pe_dropout_kernel, p=float(dropout_p), scale=scale
        )
        cost = pl.CostEstimate(
            flops=3 * Rp * C,
            transcendentals=0,
            bytes_accessed=(2 * Rp + P) * C * itemsize + Rp * C * 4,
        )
        out_rows = pl.pallas_call(
            kernel,
            out_shape=jax.ShapeDtypeStruct((Rp, C), x.dtype),
            grid=(n_tiles,),
            in_specs=[x_spec, pe_spec, u_spec],
            out_specs=out_spec,
            compiler_params=compiler_params,
            cost_estimate=cost,
        )(x_rows, pe_rows, u)

    # Strip padding and restore (B, S, D).
    out = out_rows[:R].reshape(B, Lp)[:, :per_batch].reshape(B, S, D)
    return out


# ----------------------------------------------------------------------------
# Demo / self-check
# ----------------------------------------------------------------------------
if __name__ == "__main__":
    B, S, D = 2, 8, 32          # batch=2, seq=8, d_model=32 (max_len=36)
    MAX_LEN = 36
    DROPOUT_P = 0.1

    x = jax.random.normal(jax.random.PRNGKey(0), (B, S, D), dtype=jnp.float32)
    pe = make_pe_table(D, MAX_LEN)                 # (1, 36, 32)
    ref = x + pe[:, :S, :]

    # Eval-mode forward (dropout = identity): matches the PyTorch module in .eval().
    out = positional_encoding(x, pe, dropout_p=DROPOUT_P, training=False)
    out = jax.block_until_ready(out)
    assert out.shape == x.shape and out.dtype == x.dtype
    assert jnp.allclose(out, ref, atol=1e-6, rtol=1e-6)

    # Training-mode forward: every element is either 0 (dropped) or the
    # inverted-dropout-scaled reference value.
    # TODO(synk): the dropout mask cannot be bit-identical to torch's RNG stream
    # (statistics match).
    out_tr = positional_encoding(x, pe, dropout_p=DROPOUT_P, training=True, seed=1234)
    out_tr = jax.block_until_ready(out_tr)
    assert out_tr.shape == x.shape and out_tr.dtype == x.dtype
    scaled = ref / (1.0 - DROPOUT_P)
    ok = jnp.all(
        jnp.isclose(out_tr, 0.0)
        | jnp.isclose(out_tr, scaled, atol=1e-5, rtol=1e-5)
    )
    assert bool(ok)

    print("KERNEL_OK")
</pallas_src>

<mosaic_0001>
module attributes {stable_mosaic.version = 11 : i64} {
  func.func @_add_pe_kernel(%arg0: i32, %arg1: memref<2x256xf32, #tpu.memory_space<vmem>>, %arg2: memref<2x256xf32, #tpu.memory_space<vmem>>, %arg3: memref<2x256xf32, #tpu.memory_space<vmem>>) attributes {dimension_semantics = [#tpu.dimension_semantics<parallel>], iteration_bounds = array<i64: 1>, scalar_prefetch = 0 : i64, scratch_operands = 0 : i64, tpu.core_type = #tpu.core_type<tc>, window_params = [{transform_indices = @transform_0, window_bounds = array<i64: 2, 256>}, {transform_indices = @transform_1, window_bounds = array<i64: 2, 256>}, {transform_indices = @transform_2, window_bounds = array<i64: 2, 256>}]} {
    %c0 = arith.constant 0 : index
    %c0_0 = arith.constant 0 : index
    %0 = vector.load %arg1[%c0, %c0_0] : memref<2x256xf32, #tpu.memory_space<vmem>>, vector<2x256xf32>
    %c0_1 = arith.constant 0 : index
    %c0_2 = arith.constant 0 : index
    %1 = vector.load %arg2[%c0_1, %c0_2] : memref<2x256xf32, #tpu.memory_space<vmem>>, vector<2x256xf32>
    %2 = arith.addf %0, %1 : vector<2x256xf32>
    %c0_3 = arith.constant 0 : index
    %c0_4 = arith.constant 0 : index
    %3 = vector.load %arg3[%c0_3, %c0_4] : memref<2x256xf32, #tpu.memory_space<vmem>>, vector<2x256xf32>
    tpu.vector_store %arg3[%c0_3, %c0_4], %2 {strides = array<i32>} : memref<2x256xf32, #tpu.memory_space<vmem>>, vector<2x256xf32>,
    return
  }
  func.func @transform_0(%arg0: i32) -> (i32, i32) {
    %c0_i32 = arith.constant 0 : i32
    %c0_i32_0 = arith.constant 0 : i32
    return %arg0, %c0_i32 : i32, i32
  }
  func.func @transform_1(%arg0: i32) -> (i32, i32) {
    %c1_i32 = arith.constant 1 : i32
    %c0_i32 = arith.constant 0 : i32
    %0 = arith.cmpi eq, %c1_i32, %c0_i32 : i32
    %c1_i32_0 = arith.constant 1 : i32
    %1 = arith.select %0, %c1_i32_0, %c1_i32 : i32
    %2 = arith.remsi %arg0, %1 : i32
    %c0_i32_1 = arith.constant 0 : i32
    %3 = arith.cmpi ne, %2, %c0_i32_1 : i32
    %c0_i32_2 = arith.constant 0 : i32
    %4 = arith.cmpi slt, %2, %c0_i32_2 : i32
    %c0_i32_3 = arith.constant 0 : i32
    %5 = arith.cmpi slt, %1, %c0_i32_3 : i32
    %6 = arith.xori %4, %5 : i1
    %7 = arith.andi %6, %3 : i1
    %8 = arith.addi %2, %1 : i32
    %9 = arith.select %7, %8, %2 : i32
    %c0_i32_4 = arith.constant 0 : i32
    %c0_i32_5 = arith.constant 0 : i32
    return %9, %c0_i32_4 : i32, i32
  }
  func.func @transform_2(%arg0: i32) -> (i32, i32) {
    %c0_i32 = arith.constant 0 : i32
    %c0_i32_0 = arith.constant 0 : i32
    return %arg0, %c0_i32 : i32, i32
  }
}

</mosaic_0001>

<bundles_post_ra>
// kernel: tpu_custom_call.1
= control target key start
LH: loop header
LB: loop body
LE: loop exit
PB: predicated region body
PF: predicated region fallthrough
CT: control target
= control target key end

     0   :  { %7 = vsyncpa [#allocation3], 0  ;;  %s170_s0 = inlined_call_operand.hbm [shape: f32[2,256], index: 0, kind: input, shape index: {}]   ;;  %s171_s1 = inlined_call_operand.hbm [shape: f32[2,256], index: 1, kind: input, shape index: {}]   ;;  %s172_s2 = inlined_call_operand.hbm [shape: f32[2,256], index: 2, kind: output, shape index: {}]  }
   0x1   :  { %8 = vsyncpa [#allocation6], 0 }
   0x2   :  { %9 = vsyncpa [#allocation4], 0  ;;  %s15_s11 = sshll.u32 %s170_s0, 4  ;;  %s143_s12 = smov [#allocation2]   ;;  %s16_s11 = int_to_ptr.hbm [resolvable:$true] %s15_s11 }
   0x3   :  { %s17_s13 = sshll.u32 %s143_s12, 4  ;;  %s26_s16 = sshll.u32 %s171_s1, 4  ;;  %s18_s13 = int_to_ptr.vmem [resolvable:$true] %s17_s13  ;;  %s27_s16 = int_to_ptr.hbm [resolvable:$true] %s26_s16 }
   0x4   :  { %20 = dma.hbm_to_vmem [thread:$0]  %s16_s11, 64, %s18_s13, [#allocation3]  }
   0x5   :  { %s144_s17 = smov [#allocation5]  }
   0x6   :  { %s28_s18 = sshll.u32 %s144_s17, 4  ;;  %s29_s18 = int_to_ptr.vmem [resolvable:$true] %s28_s18 }
   0x7   :  { %31 = dma.hbm_to_vmem [thread:$0]  %s27_s16, 64, %s29_s18, [#allocation6]  }
   0x8   :  { %137 = dma.done.wait [#allocation3], 64  }
   0x9   :  { %138 = vsyncadd [#allocation3], 4294967232 }
   0xa   :  { %139 = dma.done.wait [#allocation6], 64  }
   0xb   :  { %140 = vsyncadd [#allocation6], 4294967232  ;;  %s145_s19 = smov [#allocation7]   ;;  %s51_s22 = sshll.u32 %s172_s2, 4  ;;  %v40_v0 = vld [vmem:[#allocation2] sm:$0xf]  ;;  %s52_s22 = int_to_ptr.hbm [resolvable:$true] %s51_s22 }
   0xc   :  { %s49_s0 = sshll.u32 %s145_s19, 4  ;;  %v41_v1 = vld [vmem:[#allocation5] sm:$0xf]  ;;  %s50_s0 = int_to_ptr.vmem [resolvable:$true] %s49_s0 }
   0xd   :  { %v42_v2 = vadd.f32 %v41_v1, %v40_v0 }
   0xf   :  { %43 = vst [vmem:[#allocation7] sm:$0xf] %v42_v2 }
  0x10   :  { %54 = dma.vmem_to_hbm [thread:$0]  %s50_s0, 64, %s52_s22, [#allocation4]  }
  0x11   :  { %141 = dma.done.wait [#allocation4], 64  }
  0x12   :  { %142 = vsyncadd [#allocation4], 4294967232 }
  0x13   :  { %59 = vsyncpa [#allocation3], 1 }
  0x14   :  { %60 = vsyncpa [#allocation6], 1 }
  0x15   :  { %61 = vsyncpa [#allocation4], 1 }

</bundles_post_ra>
